<compile_context>
chip_gen: v7x
topology: tpu7x:2x2x1
jax: 0.10.0
libtpu: 0.0.40
codegen_flags: <defaults>
</compile_context>

<pallas_src>
import functools

import jax
import jax.numpy as jnp
from jax.experimental import pallas as pl
from jax.experimental.pallas import tpu as pltpu


def _make_proj_kernel(b_tile):
    def kernel(p_ref, w_ref, add_ref, o_ref):
        # p_ref  : (b_tile, seq, patch_dim) bf16  (pipelined over batch tiles)
        # w_ref  : (patch_dim, emb)         bf16  (resident)
        # add_ref: (seq, emb)               f32   (resident cls/bias/pos table)
        # o_ref  : (b_tile, seq, emb)       f32   (final layout, no epilogue)
        w = w_ref[...]
        add = add_ref[...]
        for i in range(b_tile):  # static unroll; b_tile is capped small
            o_ref[i] = (
                jnp.dot(p_ref[i], w, preferred_element_type=jnp.float32) + add
            )
    return kernel


@functools.partial(jax.jit, static_argnums=(5,))
def patch_embedding_linear(x, weight, bias, cls_token, positions, patch_size):
    """x: (b, c, h, w). weight: (emb, patch_size*c). Returns (b, h*(w//ps)+1, emb) f32."""
    b, c, h, w = x.shape
    ps = patch_size
    assert w % ps == 0
    w_out = w // ps
    n_patches = h * w_out
    seq = n_patches + 1
    emb = weight.shape[0]
    patch_dim = ps * c
    assert weight.shape[1] == patch_dim
    assert positions.shape == (seq, emb)

    # ---- weight K-order permuted (s2, c) -> (c, s2); done once, weight is tiny.
    w_perm = weight.reshape(emb, ps, c).transpose(0, 2, 1).reshape(emb, patch_dim)
    w_t = jnp.transpose(w_perm).astype(jnp.bfloat16)            # (patch_dim, emb)

    # ---- cls / bias / positions folded into one small resident f32 table.
    addtab = jnp.concatenate(
        [cls_token.reshape(1, emb).astype(jnp.float32)
         + positions[0:1].astype(jnp.float32),
         positions[1:].astype(jnp.float32)
         + bias.astype(jnp.float32)[None, :]],
        axis=0)                                                  # (seq, emb)

    # ---- einops rearrange (layout glue): contiguous ps-length chunks, bf16,
    # zero cls row prepended so the kernel writes the final layout directly.
    xb = x.astype(jnp.bfloat16)
    p = xb.reshape(b, c, h, w_out, ps)
    p = jnp.transpose(p, (0, 2, 3, 1, 4))                        # (b,h,w_out,c,ps)
    p = p.reshape(b, n_patches, patch_dim)
    p = jnp.pad(p, ((0, 0), (1, 0), (0, 0)))                     # (b, seq, patch_dim)

    # ---- batch-tile selection from a conservative VMEM budget.
    # Double-buffered per-step bytes per batch element: patches (bf16) + out (f32).
    vmem_budget = 12 * 1024 * 1024
    bytes_per_batch_elem = seq * (patch_dim * 2 * 2 + emb * 4 * 2)
    b_tile = max(1, min(vmem_budget // max(bytes_per_batch_elem, 1), 64))
    if b >= 2:
        b_tile = min(b_tile, b // 2)      # guarantee grid >= 2 (v7x: 2 TensorCores)
    b_tile = max(1, min(b_tile, b))
    grid_b = pl.cdiv(b, b_tile)
    b_pad = grid_b * b_tile
    if b_pad != b:
        p = jnp.pad(p, ((0, b_pad - b), (0, 0), (0, 0)))

    out = pl.pallas_call(
        _make_proj_kernel(b_tile),
        out_shape=jax.ShapeDtypeStruct((b_pad, seq, emb), jnp.float32),
        grid_spec=pltpu.PrefetchScalarGridSpec(
            num_scalar_prefetch=0,
            grid=(grid_b,),
            in_specs=[
                pl.BlockSpec((b_tile, seq, patch_dim), lambda i: (i, 0, 0)),
                pl.BlockSpec((patch_dim, emb), lambda i: (0, 0)),
                pl.BlockSpec((seq, emb), lambda i: (0, 0)),
            ],
            out_specs=pl.BlockSpec((b_tile, seq, emb), lambda i: (i, 0, 0)),
        ),
        compiler_params=pltpu.CompilerParams(
            dimension_semantics=("parallel",),
            # Let XLA fuse the bf16 cast / chunked transpose / cls-row pad into
            # the patches input feed instead of materializing a copy in HBM.
            allow_input_fusion=[True, False, False],
        ),
    )(p, w_t, addtab)

    if b_pad != b:
        out = out[:b]
    return out


def _reference(x, weight, bias, cls_token, positions, patch_size):
    b, c, h, w = x.shape
    ps = patch_size
    w_out = w // ps
    patches = x.astype(jnp.float32).reshape(b, c, h, w_out, ps)
    patches = jnp.transpose(patches, (0, 2, 3, 4, 1)).reshape(b, h * w_out, ps * c)
    proj = patches @ weight.T + bias
    cls = jnp.broadcast_to(cls_token.reshape(1, 1, -1), (b, 1, weight.shape[0]))
    out = jnp.concatenate([cls, proj], axis=1)
    return out + positions


if __name__ == "__main__":
    # Small shapes consistent with the module:
    #   in_channels=4, patch_size=16, emb_size=32, seq_length=256
    #   x: (2, 4, 16, 16) -> n_patches = 16 = seq_length // patch_size
    in_channels, patch_size, emb_size, seq_length = 4, 16, 32, 256
    b, h, w = 2, 16, 16
    patch_dim = patch_size * in_channels

    key = jax.random.PRNGKey(0)
    kx, kw, kb, kc, kp = jax.random.split(key, 5)

    x = jax.random.normal(kx, (b, in_channels, h, w), dtype=jnp.float32)
    # nn.Linear-style deterministic init (uniform in +-1/sqrt(fan_in))
    bound = 1.0 / (patch_dim ** 0.5)
    weight = jax.random.uniform(kw, (emb_size, patch_dim), jnp.float32, -bound, bound)
    bias = jax.random.uniform(kb, (emb_size,), jnp.float32, -bound, bound)
    cls_token = jax.random.normal(kc, (1, 1, emb_size), dtype=jnp.float32)
    positions = jax.random.normal(kp, (seq_length // patch_size + 1, emb_size),
                                  dtype=jnp.float32)

    out = patch_embedding_linear(x, weight, bias, cls_token, positions, patch_size)
    out = jax.block_until_ready(out)

    ref = _reference(x, weight, bias, cls_token, positions, patch_size)
    assert out.shape == (b, seq_length // patch_size + 1, emb_size)
    # bf16 MXU inputs -> compare against the f32 reference with bf16 tolerance.
    assert jnp.allclose(out, ref, atol=5e-2, rtol=5e-2), \
        float(jnp.max(jnp.abs(out - ref)))

    print("KERNEL_OK")
</pallas_src>

<mosaic_0001>
module attributes {stable_mosaic.version = 11 : i64} {
  func.func @kernel(%arg0: i32, %arg1: memref<1x17x64xbf16, #tpu.memory_space<vmem>>, %arg2: memref<64x32xbf16, #tpu.memory_space<vmem>>, %arg3: memref<17x32xf32, #tpu.memory_space<vmem>>, %arg4: memref<1x17x32xf32, #tpu.memory_space<vmem>>) attributes {dimension_semantics = [#tpu.dimension_semantics<parallel>], iteration_bounds = array<i64: 2>, scalar_prefetch = 0 : i64, scratch_operands = 0 : i64, tpu.core_type = #tpu.core_type<tc>, window_params = [{transform_indices = @transform_0, window_bounds = array<i64: 1, 17, 64>}, {pipeline_mode = #tpu.pipeline_mode<synchronous>, transform_indices = @transform_1, window_bounds = array<i64: 64, 32>}, {pipeline_mode = #tpu.pipeline_mode<synchronous>, transform_indices = @transform_2, window_bounds = array<i64: 17, 32>}, {transform_indices = @transform_3, window_bounds = array<i64: 1, 17, 32>}]} {
    %c0 = arith.constant 0 : index
    %c0_0 = arith.constant 0 : index
    %0 = vector.load %arg2[%c0, %c0_0] : memref<64x32xbf16, #tpu.memory_space<vmem>>, vector<64x32xbf16>
    %c0_1 = arith.constant 0 : index
    %c0_2 = arith.constant 0 : index
    %1 = vector.load %arg3[%c0_1, %c0_2] : memref<17x32xf32, #tpu.memory_space<vmem>>, vector<17x32xf32>
    %c0_3 = arith.constant 0 : index
    %c0_4 = arith.constant 0 : index
    %c0_5 = arith.constant 0 : index
    %2 = vector.load %arg1[%c0_3, %c0_4, %c0_5] : memref<1x17x64xbf16, #tpu.memory_space<vmem>>, vector<1x17x64xbf16>
    %3 = vector.shape_cast %2 : vector<1x17x64xbf16> to vector<17x64xbf16>
    %cst = arith.constant dense<0.000000e+00> : vector<17x32xf32>
    %4 = tpu.matmul %3, %0, %cst {dimension_numbers = #tpu.dot_dimension_numbers<[1], [0], [0], [1], [0, 0, 1, 1], [], []>} : vector<17x64xbf16>, vector<64x32xbf16>, vector<17x32xf32> -> vector<17x32xf32>
    %5 = arith.addf %4, %1 : vector<17x32xf32>
    %c0_6 = arith.constant 0 : index
    %c0_7 = arith.constant 0 : index
    %c0_8 = arith.constant 0 : index
    %6 = vector.load %arg4[%c0_6, %c0_7, %c0_8] : memref<1x17x32xf32, #tpu.memory_space<vmem>>, vector<1x17x32xf32>
    %7 = vector.shape_cast %6 : vector<1x17x32xf32> to vector<17x32xf32>
    %8 = vector.shape_cast %5 : vector<17x32xf32> to vector<1x17x32xf32>
    tpu.vector_store %arg4[%c0_6, %c0_7, %c0_8], %8 {strides = array<i32>} : memref<1x17x32xf32, #tpu.memory_space<vmem>>, vector<1x17x32xf32>,
    return
  }
  func.func @transform_0(%arg0: i32) -> (i32, i32, i32) {
    %c0_i32 = arith.constant 0 : i32
    %c0_i32_0 = arith.constant 0 : i32
    %c0_i32_1 = arith.constant 0 : i32
    return %arg0, %c0_i32, %c0_i32_0 : i32, i32, i32
  }
  func.func @transform_1(%arg0: i32) -> (i32, i32) {
    %c0_i32 = arith.constant 0 : i32
    %c0_i32_0 = arith.constant 0 : i32
    %c0_i32_1 = arith.constant 0 : i32
    return %c0_i32, %c0_i32_0 : i32, i32
  }
  func.func @transform_2(%arg0: i32) -> (i32, i32) {
    %c0_i32 = arith.constant 0 : i32
    %c0_i32_0 = arith.constant 0 : i32
    %c0_i32_1 = arith.constant 0 : i32
    return %c0_i32, %c0_i32_0 : i32, i32
  }
  func.func @transform_3(%arg0: i32) -> (i32, i32, i32) {
    %c0_i32 = arith.constant 0 : i32
    %c0_i32_0 = arith.constant 0 : i32
    %c0_i32_1 = arith.constant 0 : i32
    return %arg0, %c0_i32, %c0_i32_0 : i32, i32, i32
  }
}

</mosaic_0001>

<bundles_post_ra>
// kernel: patch_embedding_linear.2
= control target key start
LH: loop header
LB: loop body
LE: loop exit
PB: predicated region body
PF: predicated region fallthrough
CT: control target
= control target key end

     0   :  { %s493_s17 = smov 0   ;;  %s539_s0 = inlined_call_operand.vmem [shape: bf16[64,32], index: 0, kind: input, shape index: {}]   ;;  %s540_s1 = inlined_call_operand.vmem [shape: f32[17,32], index: 1, kind: input, shape index: {}]   ;;  %s541_s2 = inlined_call_operand.vmem [shape: bf16[2,16,64], index: 2, kind: input, shape index: {}]   ;;  %s542_s3 = inlined_call_operand.<no memory space> [shape: bf16[], index: 3, kind: input, shape index: {}]   ;;  %s543_s4 = inlined_call_operand.vmem [shape: f32[2,17,32], index: 4, kind: output, shape index: {}]  }
   0x1   :  { %v9_v0 = vstv %s542_s3 }
   0x2   :  { %v491_v1 = vunpack.i.l.bf16 %v9_v0 }
   0x3 LB: > { %s398_s18 = sadd.s32 4294967295, %s460_s17   ;;  %p402_p0 = scmp.ge.s32.totalorder %s460_s17, 1  ;;  %s460_s17 = sphi %s493_s17, %s19_s17  }
   0x4   : > { %p144_p1 = scmp.lt.s32.totalorder %s460_s17, 3 }
   0x6   : > { %p145_p2 = pnand %p402_p0, %p144_p1 }
   0x8   : > { %148 = sbr.rel (%p145_p2) target bundleno = 256 (0x100), region = 32 }
   0xf   : > { %v448_v2 = vld [vmem:[%s539_s0] sm:$0xff]   ;;  %p169_p3 = scmp.lt.s32.totalorder %s398_s18, 1  ;;  %v195_v3 = vlaneseq  ;;  %v449_v4 = vld [vmem:[%s539_s0 + $0x8] sm:$0xff]   ;;  %v450_v6 = vld [vmem:[%s539_s0 + $0x10] sm:$0xff]   ;;  %vm200_vm1 = vcmask 1046528   ;;  %v462_v19 = vmov 0.0  }
  0x10   : > { %426 = vmatprep.subr.bf16.mxu0 %v448_v2  ;;  %v451_v10 = vld [vmem:[%s539_s0 + $0x18] sm:$0xff]   ;;  %vm276_vm2 = vcmask 523264   ;;  %v240_v25 = vld [vmem:[%s540_s1 + $0x10] sm:$0x1]  ;;  %v238_v26 = vld [vmem:[%s540_s1] sm:$0xff]  ;;  %vm334_vm3 = vcmask 253952  }
  0x11   : > { %s545_s18 = smov (!%p169_p3, %s398_s18), 1  ;;  %427 = vmatpush3.bf16.msra.mxu0 %v448_v2  ;;  %v196_v5 = vand.u32 127, %v195_v3  ;;  %vm331_vm4 = vcmask 261120   ;;  %v239_v30 = vld [vmem:[%s540_s1 + $0x8] sm:$0xff] }
  0x12   : > { %428 = vmatprep.subr.bf16.mxu0 %v449_v4  ;;  %s419_s24 = sshll.u32 %s545_s18, 3  ;;  %s438_s30 = smul.u32 24, %s545_s18 }
  0x13   : > { %s369_s27 = scalar_lea.vmem %s541_s2, %s419_s24  ;;  %vm198_vm0 = vcmp.lt.s32.totalorder %v196_v5, 64 }
  0x14   : > { %v407_v7 = vld [vmem:[%s369_s27] sm:$0xff]   ;;  %s179_s11 = scalar_lea.vmem %s543_s4, %s438_s30 }
  0x15   : > { %429 = vmatpush3.bf16.msra.mxu0 %v449_v4  ;;  %v193_v8 = vunpack.c.l.bf16 %v407_v7  ;;  %v208_v9 = vunpack.c.h.bf16 %v407_v7 }
  0x16   : > { %430 = vmatprep.subr.bf16.mxu0 %v450_v6 }
  0x17   : > { %v199_v11 = vsel %vm198_vm0, %v193_v8, %v491_v1  ;;  %v214_v12 = vsel %vm198_vm0, %v208_v9, %v491_v1 }
  0x18   : > { %v201_v13 = vsel %vm200_vm1, %v199_v11, %v491_v1  ;;  %v216_v14 = vsel %vm200_vm1, %v214_v12, %v199_v11  ;;  %v223_v15 = vsel %vm200_vm1, %v491_v1, %v214_v12 }
  0x19   : > { %431 = vmatpush3.bf16.msra.mxu0 %v450_v6  ;;  %v202_v16 = vrot.slane %v201_v13, 7  ;;  %v217_v17 = vrot.slane %v216_v14, 7  ;;  %v224_v18 = vrot.slane %v223_v15, 7 }
  0x1a   : > { %432 = vmatprep.subr.bf16.mxu0 %v451_v10 }
  0x1b   : > { %v203_v20 = vpack.c.bf16 %v462_v19, %v202_v16  ;;  %v219_v21 = vpack.c.bf16 %v462_v19, %v217_v17  ;;  %v226_v22 = vpack.c.bf16 %v462_v19, %v224_v18 }
  0x1d   : > { %433 = vmatpush3.bf16.msra.mxu0 %v451_v10  ;;  %205 = vst [vmem:[#allocation7] sm:$0xf] %v203_v20  ;;  %221 = vst [vmem:[#allocation7 + $0x4] sm:$0xf] %v219_v21 }
  0x1e   : > { %228 = vst [vmem:[#allocation7 + $0x8] sm:$0xf] %v226_v22 }
  0x24   : > { %v452_v23 = vld [vmem:[#allocation7] sm:$0xff]  }
  0x25   : > { %v453_v24 = vld [vmem:[#allocation7 + $0x8] ss:$0 sps:$4 sm:$0x11]   ;;  %434 = vmatprep.mubr.msk.bf16.mxu0 %vm276_vm2, %v452_v23 }
  0x26   : > { %435 = vmatmul.mubr.msk.bf16.vlgmr.msra.gmra.mrb[0].mxu0 %vm276_vm2, %v453_v24 }
  0xf9   : > { %v436_v27 = vpop.f32.mrb[0].mxu0 }
  0xfa   : > { %v326_v28 = vadd.f32 %v436_v27, %v240_v25  ;;  %v317_v29 = vpop.f32.mrb[1].mxu0 }
  0xfb   : > { %v318_v31 = vadd.f32 %v317_v29, %v238_v26  ;;  %v437_v32 = vpop.f32.mrb[2].mxu0 }
  0xfc   : > { %335 = vst.msk [vmem:[%s179_s11 + $0x10] sm:$0x1] %vm334_vm3, %v326_v28  ;;  %v320_v33 = vpop.f32.mrb[3].mxu0 }
  0xfd   : > { %332 = vst.msk [vmem:[%s179_s11] sm:$0xff] %vm331_vm4, %v318_v31  ;;  %v321_v34 = vadd.f32 %v320_v33, %v239_v30 }
  0xff   : > { %333 = vst.msk [vmem:[%s179_s11 + $0x8] sm:$0xff] %vm331_vm4, %v321_v34 }
 0x100 PF: > { %s19_s17 = sadd.s32 1, %s460_s17  }
 0x101   : > { %p16_p4 = scmp.ge.s32.totalorder %s19_s17, 4  }
 0x103   :  { %18 = sbr.rel (!%p16_p4) target bundleno = 3 (0x3), region = 66 }

</bundles_post_ra>
